<compile_context>
chip_gen: v7x
topology: tpu7x:2x2x1
jax: 0.10.0
libtpu: 0.0.40
codegen_flags: <defaults>
</compile_context>

<pallas_src>
import functools
import math

import jax
import jax.numpy as jnp
from jax import lax
from jax.experimental import pallas as pl
from jax.experimental.pallas import tpu as pltpu

_INV_SQRT2 = 1.0 / math.sqrt(2.0)
_GELU_TANH_C = math.sqrt(2.0 / math.pi)


def _round_up(n, m):
    return ((n + m - 1) // m) * m


def _vmem_budget_bytes():
    """Generation-aware VMEM budget (leave headroom for compiler scratch)."""
    cap = 64 * 1024 * 1024  # conservative default (v7x physical VMEM per TC)
    try:
        cap = int(pltpu.get_tpu_info().vmem_capacity_bytes)
    except Exception:
        pass
    return int(cap * 0.85)  # ~54 MiB on v7x, ~109 MiB on v5e/v6e


def _gelu_f32(h, approx):
    if approx:
        # tanh-approx gelu: transcendental goes to the EUP slot (v6e/v7x).
        return 0.5 * h * (1.0 + jnp.tanh(_GELU_TANH_C * (h + 0.044715 * h * h * h)))
    # exact-erf gelu (matches the PyTorch reference), computed in f32.
    return h * (0.5 * (1.0 + lax.erf(h * _INV_SQRT2)))


# ----------------------------------------------------------------------------
# Kernel 1: resident-weight path (weights fit in VMEM, grid over rows only)
# ----------------------------------------------------------------------------
def _ffn_kernel_resident(x_ref, w1_ref, b1_ref, w2_ref, b2_ref, o_ref, *,
                         approx_gelu):
    # x_ref:  [TM, D]  row tile
    # w1_ref: [D, F]   b1_ref: [1, F]   (resident across all grid steps)
    # w2_ref: [F, D]   b2_ref: [1, D]
    h = jnp.dot(x_ref[...], w1_ref[...], preferred_element_type=jnp.float32)
    h = h + b1_ref[...].astype(jnp.float32)
    h = _gelu_f32(h, approx_gelu)
    # dropout: identity (eval / inference mode)
    out = jnp.dot(h.astype(w2_ref.dtype), w2_ref[...],
                  preferred_element_type=jnp.float32)
    out = out + b2_ref[...].astype(jnp.float32)
    o_ref[...] = out.astype(o_ref.dtype)


# ----------------------------------------------------------------------------
# Kernel 2: F-tiled accumulator path (large d_ff; weights streamed in F tiles)
# ----------------------------------------------------------------------------
def _ffn_kernel_ftiled(x_ref, w1_ref, b1_ref, w2_ref, b2_ref, o_ref, acc_ref, *,
                       approx_gelu):
    # x_ref:  [TM, D]    w1_ref: [D, TF]   b1_ref: [1, TF]
    # w2_ref: [TF, D]    b2_ref: [1, D]    acc_ref: [TM, D] f32 scratch
    f = pl.program_id(1)

    @pl.when(f == 0)
    def _():
        acc_ref[...] = jnp.zeros_like(acc_ref)

    h = jnp.dot(x_ref[...], w1_ref[...], preferred_element_type=jnp.float32)
    h = h + b1_ref[...].astype(jnp.float32)
    h = _gelu_f32(h, approx_gelu)
    acc_ref[...] += jnp.dot(h.astype(w2_ref.dtype), w2_ref[...],
                            preferred_element_type=jnp.float32)

    @pl.when(f == pl.num_programs(1) - 1)
    def _():
        out = acc_ref[...] + b2_ref[...].astype(jnp.float32)
        o_ref[...] = out.astype(o_ref.dtype)


def positionwise_ffn(x, w1, b1, w2, b2, *, tm=512, tf=512,
                     matmul_dtype=None, approx_gelu=False, use_f_tiling=None):
    """Transformer positionwise FFN: ff2(gelu(ff1(x))).

    x:  [B, T, D];  w1: [D, F], b1: [F];  w2: [F, D], b2: [D]
    (weights stored pre-transposed as [in, out]).
    """
    B, T, D = x.shape
    F = w1.shape[1]
    M = B * T
    out_dtype = x.dtype

    if matmul_dtype is not None:
        # bf16 operands -> full MXU rate, half weight DMA/VMEM (f32 accumulate kept).
        x = x.astype(matmul_dtype)
        w1 = w1.astype(matmul_dtype)
        w2 = w2.astype(matmul_dtype)

    x_bpe = jnp.dtype(x.dtype).itemsize
    w_bpe = jnp.dtype(w1.dtype).itemsize
    out_bpe = jnp.dtype(out_dtype).itemsize

    budget = _vmem_budget_bytes()
    weight_bytes = ((D * F + F * D) * w_bpe
                    + (F + D) * jnp.dtype(b1.dtype).itemsize)

    if use_f_tiling is None:
        # Resident weights only if a single copy fits comfortably per TC.
        use_f_tiling = weight_bytes > 0.6 * budget

    x2d = x.reshape(M, D)
    b1_2d = b1.reshape(1, F)
    b2_2d = b2.reshape(1, D)

    cost = pl.CostEstimate(
        flops=4 * M * D * F,
        transcendentals=M * F,
        bytes_accessed=int(M * D * (x_bpe + out_bpe) + weight_bytes),
    )

    def _pick_tm(avail_bytes, per_row_bytes, requested):
        tm_cap = max(16, (max(avail_bytes, per_row_bytes * 8) // per_row_bytes)
                     // 16 * 16)
        t = min(requested, tm_cap, _round_up(M, 16))
        if M >= 32:
            # >= 2 grid steps so the "parallel" row axis shards over both TCs (v7x).
            t = min(t, _round_up(-(-M // 2), 16))
        return max(t, 16)

    if not use_f_tiling:
        # -------- resident-weight path --------
        def run_resident(single_buffer_weights):
            wcopies = 1 if single_buffer_weights else 2
            # per row: double-buffered in/out tiles + f32 [tm, F] intermediates.
            per_row = 2 * D * x_bpe + 2 * D * out_bpe + 3 * F * 4
            tm_local = _pick_tm(budget - wcopies * weight_bytes, per_row, tm)
            m_pad = _round_up(M, tm_local)
            xp = x2d if m_pad == M else jnp.pad(x2d, ((0, m_pad - M), (0, 0)))

            # Single-buffer the constant-index weights (pure VMEM saving).
            wkw = ({"pipeline_mode": pl.Buffered(1)}
                   if single_buffer_weights else {})

            out = pl.pallas_call(
                functools.partial(_ffn_kernel_resident, approx_gelu=approx_gelu),
                out_shape=jax.ShapeDtypeStruct((m_pad, D), out_dtype),
                grid_spec=pltpu.PrefetchScalarGridSpec(
                    num_scalar_prefetch=0,
                    grid=(m_pad // tm_local,),
                    in_specs=[
                        pl.BlockSpec((tm_local, D), lambda i: (i, 0)),   # x rows
                        pl.BlockSpec((D, F), lambda i: (0, 0), **wkw),   # W1
                        pl.BlockSpec((1, F), lambda i: (0, 0), **wkw),   # b1
                        pl.BlockSpec((F, D), lambda i: (0, 0), **wkw),   # W2
                        pl.BlockSpec((1, D), lambda i: (0, 0), **wkw),   # b2
                    ],
                    out_specs=pl.BlockSpec((tm_local, D), lambda i: (i, 0)),
                ),
                compiler_params=pltpu.CompilerParams(
                    dimension_semantics=("parallel",),
                    vmem_limit_bytes=budget),
                cost_estimate=cost,
            )(xp, w1, b1_2d, w2, b2_2d)
            return out[:M] if m_pad != M else out

        try:
            out2d = run_resident(True)
        except Exception:
            # Buffered(1) not accepted for inputs on this JAX build -> default
            # double-buffered weight specs.
            out2d = run_resident(False)

    else:
        # -------- F-tiled accumulator path (large d_ff) --------
        tf_local = max(128, _round_up(min(tf, F), 128))
        f_pad = _round_up(F, tf_local)
        w1p, b1p, w2p = w1, b1_2d, w2
        if f_pad != F:
            # Zero padding is exact: gelu(0) = 0 and 0 @ 0-rows contributes 0.
            w1p = jnp.pad(w1, ((0, 0), (0, f_pad - F)))
            b1p = jnp.pad(b1_2d, ((0, 0), (0, f_pad - F)))
            w2p = jnp.pad(w2, ((0, f_pad - F), (0, 0)))

        per_row = 2 * D * x_bpe + 2 * D * out_bpe + D * 4 + 3 * tf_local * 4
        per_step_w = 2 * (D * tf_local + tf_local * D) * w_bpe  # double-buffered tiles
        tm_local = _pick_tm(budget - per_step_w, per_row, tm)
        m_pad = _round_up(M, tm_local)
        xp = x2d if m_pad == M else jnp.pad(x2d, ((0, m_pad - M), (0, 0)))

        out2d = pl.pallas_call(
            functools.partial(_ffn_kernel_ftiled, approx_gelu=approx_gelu),
            out_shape=jax.ShapeDtypeStruct((m_pad, D), out_dtype),
            grid_spec=pltpu.PrefetchScalarGridSpec(
                num_scalar_prefetch=0,
                grid=(m_pad // tm_local, f_pad // tf_local),
                in_specs=[
                    pl.BlockSpec((tm_local, D), lambda i, f: (i, 0)),   # x rows
                    pl.BlockSpec((D, tf_local), lambda i, f: (0, f)),   # W1 cols
                    pl.BlockSpec((1, tf_local), lambda i, f: (0, f)),   # b1 tile
                    pl.BlockSpec((tf_local, D), lambda i, f: (f, 0)),   # W2 rows
                    pl.BlockSpec((1, D), lambda i, f: (0, 0)),          # b2
                ],
                out_specs=pl.BlockSpec((tm_local, D), lambda i, f: (i, 0)),
                scratch_shapes=[pltpu.VMEM((tm_local, D), jnp.float32)],
            ),
            compiler_params=pltpu.CompilerParams(
                dimension_semantics=("parallel", "arbitrary"),
                vmem_limit_bytes=budget),
            cost_estimate=cost,
        )(xp, w1p, b1p, w2p, b2_2d)
        if m_pad != M:
            out2d = out2d[:M]

    return out2d.reshape(B, T, D)


def _reference(x, w1, b1, w2, b2):
    h = jnp.einsum("btd,df->btf", x, w1) + b1
    h = h * 0.5 * (1.0 + lax.erf(h / jnp.sqrt(2.0)))
    return jnp.einsum("btf,fd->btd", h, w2) + b2


if __name__ == "__main__":
    # Small shapes consistent with the module's B*T*D input convention.
    B, T, d_model, d_ff = 2, 8, 32, 256

    key = jax.random.PRNGKey(0)
    k_x, k_w1, k_b1, k_w2, k_b2 = jax.random.split(key, 5)

    x = jax.random.normal(k_x, (B, T, d_model), dtype=jnp.float32)

    # Deterministic parameter init (PyTorch nn.Linear-style uniform bounds),
    # stored pre-transposed as [in, out] for the kernel.
    bound1 = 1.0 / math.sqrt(d_model)
    w1 = jax.random.uniform(k_w1, (d_model, d_ff), jnp.float32, -bound1, bound1)
    b1 = jax.random.uniform(k_b1, (d_ff,), jnp.float32, -bound1, bound1)

    bound2 = 1.0 / math.sqrt(d_ff)
    w2 = jax.random.uniform(k_w2, (d_ff, d_model), jnp.float32, -bound2, bound2)
    b2 = jax.random.uniform(k_b2, (d_model,), jnp.float32, -bound2, bound2)

    ref = _reference(x, w1, b1, w2, b2)

    # Path 1: resident-weight kernel (auto-selected for small weights).
    out = jax.block_until_ready(positionwise_ffn(x, w1, b1, w2, b2))
    assert out.shape == (B, T, d_model)
    assert jnp.allclose(out, ref, atol=1e-5, rtol=1e-5), "resident-path mismatch"

    # Path 2: F-tiled accumulator kernel (used when d_ff weights exceed the
    # per-TC VMEM budget, e.g. big models on v7x) -- exercised here with a
    # small TF to verify the accumulate-over-F logic.
    out_f = jax.block_until_ready(
        positionwise_ffn(x, w1, b1, w2, b2, tf=128, use_f_tiling=True))
    assert jnp.allclose(out_f, ref, atol=1e-5, rtol=1e-5), "F-tiled-path mismatch"

    print("KERNEL_OK")
</pallas_src>

<mosaic_0001>
module attributes {stable_mosaic.version = 11 : i64} {
  func.func @_ffn_kernel_resident(%arg0: i32, %arg1: memref<16x32xf32, #tpu.memory_space<vmem>>, %arg2: memref<32x256xf32, #tpu.memory_space<vmem>>, %arg3: memref<1x256xf32, #tpu.memory_space<vmem>>, %arg4: memref<256x32xf32, #tpu.memory_space<vmem>>, %arg5: memref<1x32xf32, #tpu.memory_space<vmem>>, %arg6: memref<16x32xf32, #tpu.memory_space<vmem>>) attributes {dimension_semantics = [#tpu.dimension_semantics<parallel>], iteration_bounds = array<i64: 1>, scalar_prefetch = 0 : i64, scratch_operands = 0 : i64, tpu.core_type = #tpu.core_type<tc>, window_params = [{transform_indices = @transform_0, window_bounds = array<i64: 16, 32>}, {pipeline_mode = #tpu.pipeline_mode<synchronous>, transform_indices = @transform_1, window_bounds = array<i64: 32, 256>}, {pipeline_mode = #tpu.pipeline_mode<synchronous>, transform_indices = @transform_2, window_bounds = array<i64: 1, 256>}, {pipeline_mode = #tpu.pipeline_mode<synchronous>, transform_indices = @transform_3, window_bounds = array<i64: 256, 32>}, {pipeline_mode = #tpu.pipeline_mode<synchronous>, transform_indices = @transform_4, window_bounds = array<i64: 1, 32>}, {transform_indices = @transform_5, window_bounds = array<i64: 16, 32>}]} {
    %c0 = arith.constant 0 : index
    %c0_0 = arith.constant 0 : index
    %0 = vector.load %arg1[%c0, %c0_0] : memref<16x32xf32, #tpu.memory_space<vmem>>, vector<16x32xf32>
    %c0_1 = arith.constant 0 : index
    %c0_2 = arith.constant 0 : index
    %1 = vector.load %arg2[%c0_1, %c0_2] : memref<32x256xf32, #tpu.memory_space<vmem>>, vector<32x256xf32>
    %cst = arith.constant dense<0.000000e+00> : vector<16x256xf32>
    %2 = tpu.matmul %0, %1, %cst {dimension_numbers = #tpu.dot_dimension_numbers<[1], [0], [0], [1], [0, 0, 1, 1], [], []>} : vector<16x32xf32>, vector<32x256xf32>, vector<16x256xf32> -> vector<16x256xf32>
    %c0_3 = arith.constant 0 : index
    %c0_4 = arith.constant 0 : index
    %3 = vector.load %arg3[%c0_3, %c0_4] : memref<1x256xf32, #tpu.memory_space<vmem>>, vector<1x256xf32>
    %4 = vector.broadcast %3 : vector<1x256xf32> to vector<16x256xf32>
    %5 = arith.addf %2, %4 : vector<16x256xf32>
    %cst_5 = arith.constant 0.707106769 : f32
    %6 = vector.broadcast %cst_5 : f32 to vector<16x256xf32>
    %7 = arith.mulf %5, %6 : vector<16x256xf32>
    %8 = math.erf %7 : vector<16x256xf32>
    %cst_6 = arith.constant 1.000000e+00 : f32
    %9 = vector.broadcast %cst_6 : f32 to vector<16x256xf32>
    %10 = arith.addf %9, %8 : vector<16x256xf32>
    %cst_7 = arith.constant 5.000000e-01 : f32
    %11 = vector.broadcast %cst_7 : f32 to vector<16x256xf32>
    %12 = arith.mulf %11, %10 : vector<16x256xf32>
    %13 = arith.mulf %5, %12 : vector<16x256xf32>
    %c0_8 = arith.constant 0 : index
    %c0_9 = arith.constant 0 : index
    %14 = vector.load %arg4[%c0_8, %c0_9] : memref<256x32xf32, #tpu.memory_space<vmem>>, vector<256x32xf32>
    %cst_10 = arith.constant dense<0.000000e+00> : vector<16x32xf32>
    %15 = tpu.matmul %13, %14, %cst_10 {dimension_numbers = #tpu.dot_dimension_numbers<[1], [0], [0], [1], [0, 0, 1, 1], [], []>} : vector<16x256xf32>, vector<256x32xf32>, vector<16x32xf32> -> vector<16x32xf32>
    %c0_11 = arith.constant 0 : index
    %c0_12 = arith.constant 0 : index
    %16 = vector.load %arg5[%c0_11, %c0_12] : memref<1x32xf32, #tpu.memory_space<vmem>>, vector<1x32xf32>
    %17 = vector.broadcast %16 : vector<1x32xf32> to vector<16x32xf32>
    %18 = arith.addf %15, %17 : vector<16x32xf32>
    %c0_13 = arith.constant 0 : index
    %c0_14 = arith.constant 0 : index
    %19 = vector.load %arg6[%c0_13, %c0_14] : memref<16x32xf32, #tpu.memory_space<vmem>>, vector<16x32xf32>
    tpu.vector_store %arg6[%c0_13, %c0_14], %18 {strides = array<i32>} : memref<16x32xf32, #tpu.memory_space<vmem>>, vector<16x32xf32>,
    return
  }
  func.func @transform_0(%arg0: i32) -> (i32, i32) {
    %c0_i32 = arith.constant 0 : i32
    %c0_i32_0 = arith.constant 0 : i32
    return %arg0, %c0_i32 : i32, i32
  }
  func.func @transform_1(%arg0: i32) -> (i32, i32) {
    %c0_i32 = arith.constant 0 : i32
    %c0_i32_0 = arith.constant 0 : i32
    %c0_i32_1 = arith.constant 0 : i32
    return %c0_i32, %c0_i32_0 : i32, i32
  }
  func.func @transform_2(%arg0: i32) -> (i32, i32) {
    %c0_i32 = arith.constant 0 : i32
    %c0_i32_0 = arith.constant 0 : i32
    %c0_i32_1 = arith.constant 0 : i32
    return %c0_i32, %c0_i32_0 : i32, i32
  }
  func.func @transform_3(%arg0: i32) -> (i32, i32) {
    %c0_i32 = arith.constant 0 : i32
    %c0_i32_0 = arith.constant 0 : i32
    %c0_i32_1 = arith.constant 0 : i32
    return %c0_i32, %c0_i32_0 : i32, i32
  }
  func.func @transform_4(%arg0: i32) -> (i32, i32) {
    %c0_i32 = arith.constant 0 : i32
    %c0_i32_0 = arith.constant 0 : i32
    %c0_i32_1 = arith.constant 0 : i32
    return %c0_i32, %c0_i32_0 : i32, i32
  }
  func.func @transform_5(%arg0: i32) -> (i32, i32) {
    %c0_i32 = arith.constant 0 : i32
    %c0_i32_0 = arith.constant 0 : i32
    return %arg0, %c0_i32 : i32, i32
  }
}

module attributes {stable_mosaic.version = 11 : i64} {
  func.func @_ffn_kernel_resident(%arg0: i32, %arg1: memref<16x32xf32, #tpu.memory_space<vmem>>, %arg2: memref<32x256xf32, #tpu.memory_space<vmem>>, %arg3: memref<1x256xf32, #tpu.memory_space<vmem>>, %arg4: memref<256x32xf32, #tpu.memory_space<vmem>>, %arg5: memref<1x32xf32, #tpu.memory_space<vmem>>, %arg6: memref<16x32xf32, #tpu.memory_space<vmem>>) attributes {dimension_semantics = [#tpu.dimension_semantics<parallel>], iteration_bounds = array<i64: 1>, scalar_prefetch = 0 : i64, scratch_operands = 0 : i64, tpu.core_type = #tpu.core_type<tc>, window_params = [{transform_indices = @transform_0, window_bounds = array<i64: 16, 32>}, {pipeline_mode = #tpu.pipeline_mode<synchronous>, transform_indices = @transform_1, window_bounds = array<i64: 32, 256>}, {pipeline_mode = #tpu.pipeline_mode<synchronous>, transform_indices = @transform_2, window_bounds = array<i64: 1, 256>}, {pipeline_mode = #tpu.pipeline_mode<synchronous>, transform_indices = @transform_3, window_bounds = array<i64: 256, 32>}, {pipeline_mode = #tpu.pipeline_mode<synchronous>, transform_indices = @transform_4, window_bounds = array<i64: 1, 32>}, {transform_indices = @transform_5, window_bounds = array<i64: 16, 32>}]} {
    %c0 = arith.constant 0 : index
    %c0_0 = arith.constant 0 : index
    %0 = vector.load %arg1[%c0, %c0_0] : memref<16x32xf32, #tpu.memory_space<vmem>>, vector<16x32xf32>
    %c0_1 = arith.constant 0 : index
    %c0_2 = arith.constant 0 : index
    %1 = vector.load %arg2[%c0_1, %c0_2] : memref<32x256xf32, #tpu.memory_space<vmem>>, vector<32x256xf32>
    %cst = arith.constant dense<0.000000e+00> : vector<16x256xf32>
    %2 = tpu.matmul %0, %1, %cst {dimension_numbers = #tpu.dot_dimension_numbers<[1], [0], [0], [1], [0, 0, 1, 1], [], []>} : vector<16x32xf32>, vector<32x256xf32>, vector<16x256xf32> -> vector<16x256xf32>
    %c0_3 = arith.constant 0 : index
    %c0_4 = arith.constant 0 : index
    %3 = vector.load %arg3[%c0_3, %c0_4] : memref<1x256xf32, #tpu.memory_space<vmem>>, vector<1x256xf32>
    %4 = vector.broadcast %3 : vector<1x256xf32> to vector<16x256xf32>
    %5 = arith.addf %2, %4 : vector<16x256xf32>
    %cst_5 = arith.constant 0.707106769 : f32
    %6 = vector.broadcast %cst_5 : f32 to vector<16x256xf32>
    %7 = arith.mulf %5, %6 : vector<16x256xf32>
    %8 = math.erf %7 : vector<16x256xf32>
    %cst_6 = arith.constant 1.000000e+00 : f32
    %9 = vector.broadcast %cst_6 : f32 to vector<16x256xf32>
    %10 = arith.addf %9, %8 : vector<16x256xf32>
    %cst_7 = arith.constant 5.000000e-01 : f32
    %11 = vector.broadcast %cst_7 : f32 to vector<16x256xf32>
    %12 = arith.mulf %11, %10 : vector<16x256xf32>
    %13 = arith.mulf %5, %12 : vector<16x256xf32>
    %c0_8 = arith.constant 0 : index
    %c0_9 = arith.constant 0 : index
    %14 = vector.load %arg4[%c0_8, %c0_9] : memref<256x32xf32, #tpu.memory_space<vmem>>, vector<256x32xf32>
    %cst_10 = arith.constant dense<0.000000e+00> : vector<16x32xf32>
    %15 = tpu.matmul %13, %14, %cst_10 {dimension_numbers = #tpu.dot_dimension_numbers<[1], [0], [0], [1], [0, 0, 1, 1], [], []>} : vector<16x256xf32>, vector<256x32xf32>, vector<16x32xf32> -> vector<16x32xf32>
    %c0_11 = arith.constant 0 : index
    %c0_12 = arith.constant 0 : index
    %16 = vector.load %arg5[%c0_11, %c0_12] : memref<1x32xf32, #tpu.memory_space<vmem>>, vector<1x32xf32>
    %17 = vector.broadcast %16 : vector<1x32xf32> to vector<16x32xf32>
    %18 = arith.addf %15, %17 : vector<16x32xf32>
    %c0_13 = arith.constant 0 : index
    %c0_14 = arith.constant 0 : index
    %19 = vector.load %arg6[%c0_13, %c0_14] : memref<16x32xf32, #tpu.memory_space<vmem>>, vector<16x32xf32>
    tpu.vector_store %arg6[%c0_13, %c0_14], %18 {strides = array<i32>} : memref<16x32xf32, #tpu.memory_space<vmem>>, vector<16x32xf32>,
    return
  }
  func.func @transform_0(%arg0: i32) -> (i32, i32) {
    %c0_i32 = arith.constant 0 : i32
    %c0_i32_0 = arith.constant 0 : i32
    return %arg0, %c0_i32 : i32, i32
  }
  func.func @transform_1(%arg0: i32) -> (i32, i32) {
    %c0_i32 = arith.constant 0 : i32
    %c0_i32_0 = arith.constant 0 : i32
    %c0_i32_1 = arith.constant 0 : i32
    return %c0_i32, %c0_i32_0 : i32, i32
  }
  func.func @transform_2(%arg0: i32) -> (i32, i32) {
    %c0_i32 = arith.constant 0 : i32
    %c0_i32_0 = arith.constant 0 : i32
    %c0_i32_1 = arith.constant 0 : i32
    return %c0_i32, %c0_i32_0 : i32, i32
  }
  func.func @transform_3(%arg0: i32) -> (i32, i32) {
    %c0_i32 = arith.constant 0 : i32
    %c0_i32_0 = arith.constant 0 : i32
    %c0_i32_1 = arith.constant 0 : i32
    return %c0_i32, %c0_i32_0 : i32, i32
  }
  func.func @transform_4(%arg0: i32) -> (i32, i32) {
    %c0_i32 = arith.constant 0 : i32
    %c0_i32_0 = arith.constant 0 : i32
    %c0_i32_1 = arith.constant 0 : i32
    return %c0_i32, %c0_i32_0 : i32, i32
  }
  func.func @transform_5(%arg0: i32) -> (i32, i32) {
    %c0_i32 = arith.constant 0 : i32
    %c0_i32_0 = arith.constant 0 : i32
    return %arg0, %c0_i32 : i32, i32
  }
}

</mosaic_0001>

<bundles_post_ra>
// kernel: tpu_custom_call.1
= control target key start
LH: loop header
LB: loop body
LE: loop exit
PB: predicated region body
PF: predicated region fallthrough
CT: control target
= control target key end

     0   :  { %v396_v7 = vmov 0.0   ;;  %s578_s0 = inlined_call_operand.vmem [shape: f32[16,32], index: 0, kind: input, shape index: {}]   ;;  %s579_s1 = inlined_call_operand.vmem [shape: f32[32,256], index: 1, kind: input, shape index: {}]   ;;  %s580_s2 = inlined_call_operand.vmem [shape: f32[1,256], index: 2, kind: input, shape index: {}]   ;;  %s581_s3 = inlined_call_operand.vmem [shape: f32[256,32], index: 3, kind: input, shape index: {}]   ;;  %s582_s4 = inlined_call_operand.vmem [shape: f32[1,32], index: 4, kind: input, shape index: {}]   ;;  %s583_s5 = inlined_call_operand.hbm [shape: f32[16,32], index: 5, kind: output, shape index: {}]  }
   0x1   :  { %v24_v0 = vld [vmem:[%s579_s1 + $0x8] sm:$0xff]  ;;  %v26_v1 = vld [vmem:[%s579_s1 + $0x18] sm:$0xff]  ;;  %v23_v2 = vld [vmem:[%s579_s1] sm:$0xff]  ;;  %114 = vmatprep.mubr.f32.mxu0 %v396_v7 }
   0x2   :  { %v320_v3 = vpack.c.bf16 %v26_v1, %v24_v0  ;;  %v25_v4 = vld [vmem:[%s579_s1 + $0x10] sm:$0xff]  ;;  %v28_v5 = vld [vmem:[%s579_s1 + $0x28] sm:$0xff]  ;;  %v30_v6 = vld [vmem:[%s579_s1 + $0x38] sm:$0xff] }
   0x3   :  { %v322_v8 = vpack.c.bf16 %v25_v4, %v23_v2  ;;  %v324_v9 = vpack.c.bf16 %v30_v6, %v28_v5  ;;  %v27_v10 = vld [vmem:[%s579_s1 + $0x20] sm:$0xff]  ;;  %v29_v11 = vld [vmem:[%s579_s1 + $0x30] sm:$0xff]  ;;  %v164_v13 = vld [vmem:[%s581_s3 + $0x88] sm:$0xff] }
   0x4   :  { %321 = vmatprep.subr.bf16.mxu0 %v320_v3  ;;  %v163_v12 = vld [vmem:[%s581_s3 + $0x80] sm:$0xff]  ;;  %v326_v14 = vpack.c.bf16 %v29_v11, %v27_v10  ;;  %v148_v17 = vld [vmem:[%s581_s3 + $0x8] sm:$0xff]  ;;  %v165_v18 = vld [vmem:[%s581_s3 + $0x90] sm:$0xff] }
   0x5   :  { %323 = vmatpush1.bf16.msra.mxu0 %v322_v8  ;;  %v328_v15 = vpack.c.bf16 %v164_v13, %v163_v12  ;;  %v147_v16 = vld [vmem:[%s581_s3] sm:$0xff]  ;;  %v166_v20 = vld [vmem:[%s581_s3 + $0x98] sm:$0xff]  ;;  %v149_v21 = vld [vmem:[%s581_s3 + $0x10] sm:$0xff] }
   0x6   :  { %325 = vmatprep.subr.bf16.mxu0 %v324_v9  ;;  %v330_v19 = vpack.c.bf16 %v148_v17, %v147_v16  ;;  %v150_v22 = vld [vmem:[%s581_s3 + $0x18] sm:$0xff]  ;;  %v332_v23 = vpack.c.bf16 %v166_v20, %v165_v18 }
   0x7   :  { %329 = vmatprep.subr.bf16.mxu1 %v328_v15 }
   0x8   :  { %10 = vsyncpa [#allocation3], 0  ;;  %331 = vmatpush3.bf16.msra.mxu1 %v330_v19  ;;  %v334_v24 = vpack.c.bf16 %v150_v22, %v149_v21  ;;  %v21_v25 = vld [vmem:[%s578_s0] sm:$0xff]  ;;  %vm43_vm0 = vcmask 261120   ;;  %v22_v26 = vld [vmem:[%s578_s0 + $0x8] sm:$0xff]  ;;  %v33_v63 = vlaneseq  ;;  %s397_s24 = smov [#allocation2]  }
   0x9   :  { %327 = vmatpush1.bf16.msra.mxu0 %v326_v14  ;;  %333 = vmatprep.subr.bf16.mxu1 %v332_v23  ;;  %v167_v27 = vld [vmem:[%s581_s3 + $0xa0] sm:$0xff]  ;;  %v168_v28 = vld [vmem:[%s581_s3 + $0xa8] sm:$0xff]  ;;  %v169_v33 = vld [vmem:[%s581_s3 + $0xb0] sm:$0xff]  ;;  %s268_s25 = sshll.u32 %s397_s24, 4  ;;  %s269_s25 = int_to_ptr.vmem [resolvable:$true] %s268_s25 }
   0xa   :  { %v336_v29 = vpack.c.bf16 %v168_v28, %v167_v27  ;;  %v151_v30 = vld [vmem:[%s581_s3 + $0x20] sm:$0xff]  ;;  %v152_v31 = vld [vmem:[%s581_s3 + $0x28] sm:$0xff]  ;;  %v170_v34 = vld [vmem:[%s581_s3 + $0xb8] sm:$0xff]  ;;  %v34_v0 = vshrl.u32 %v33_v63, 7  ;;  %s372_s26 = scalar_lea.vmem %s269_s25, 256  ;;  %p377_p1 = scmp.lt.s32.totalorder %s269_s25, %s269_s25 }
   0xb   :  { %v338_v32 = vpack.c.bf16 %v152_v31, %v151_v30  ;;  %v340_v35 = vpack.c.bf16 %v170_v34, %v169_v33  ;;  %v153_v36 = vld [vmem:[%s581_s3 + $0x30] sm:$0xff]  ;;  %v154_v37 = vld [vmem:[%s581_s3 + $0x38] sm:$0xff]  ;;  %v171_v39 = vld [vmem:[%s581_s3 + $0xc0] sm:$0xff]  ;;  %p373_p0 = scmp.ne.s32.totalorder %s269_s25, %s372_s26  ;;  %p378_p2 = scmp.lt.s32.totalorder %s372_s26, %s372_s26 }
   0xc   :  { %279 = vmatmul.mubr.msk.f32.vlgmr.msra.gmra.mrb[0].mxu0 %vm43_vm0, %v21_v25  ;;  %335 = vmatpush3.bf16.msra.mxu1 %v334_v24  ;;  %v342_v38 = vpack.c.bf16 %v154_v37, %v153_v36  ;;  %v172_v40 = vld [vmem:[%s581_s3 + $0xc8] sm:$0xff]  ;;  %v155_v42 = vld [vmem:[%s581_s3 + $0x40] sm:$0xff]  ;;  %v173_v45 = vld [vmem:[%s581_s3 + $0xd0] sm:$0xff]  ;;  %v35_v1 = vsub.s32 0, %v34_v0  ;;  %v39_v3 = vsub.s32 1, %v34_v0 }
   0xd   :  { %120 = vmatprep.mubr.f32.mxu0 %v396_v7  ;;  %337 = vmatprep.subr.bf16.mxu1 %v336_v29  ;;  %v344_v41 = vpack.c.bf16 %v172_v40, %v171_v39  ;;  %v156_v43 = vld [vmem:[%s581_s3 + $0x48] sm:$0xff]  ;;  %v174_v46 = vld [vmem:[%s581_s3 + $0xd8] sm:$0xff]  ;;  %v157_v48 = vld [vmem:[%s581_s3 + $0x50] sm:$0xff]  ;;  %p379_p3 = por %p378_p2, %p377_p1 }
   0xe   :  { %v346_v44 = vpack.c.bf16 %v156_v43, %v155_v42  ;;  %v348_v47 = vpack.c.bf16 %v174_v46, %v173_v45  ;;  %v158_v49 = vld [vmem:[%s581_s3 + $0x58] sm:$0xff]  ;;  %v175_v51 = vld [vmem:[%s581_s3 + $0xe0] sm:$0xff]  ;;  %v176_v52 = vld [vmem:[%s581_s3 + $0xe8] sm:$0xff] }
   0xf   :  { %v350_v50 = vpack.c.bf16 %v158_v49, %v157_v48  ;;  %v352_v53 = vpack.c.bf16 %v176_v52, %v175_v51  ;;  %v159_v54 = vld [vmem:[%s581_s3 + $0x60] sm:$0xff]  ;;  %v160_v55 = vld [vmem:[%s581_s3 + $0x68] sm:$0xff]  ;;  %v177_v57 = vld [vmem:[%s581_s3 + $0xf0] sm:$0xff]  ;;  %p380_p4 = pnand %p379_p3, %p373_p0 }
  0x10   :  { %280 = vmatmul.mubr.msk.f32.gmra.mrb[2].mxu0 %vm43_vm0, %v22_v26  ;;  %339 = vmatpush3.bf16.msra.mxu1 %v338_v32  ;;  %v354_v56 = vpack.c.bf16 %v160_v55, %v159_v54  ;;  %v178_v58 = vld [vmem:[%s581_s3 + $0xf8] sm:$0xff]  ;;  %v161_v60 = vld [vmem:[%s581_s3 + $0x70] sm:$0xff]  ;;  %v31_v2 = vld [vmem:[%s580_s2] sm:$0x3] }
  0x11   :  { %341 = vmatprep.subr.bf16.mxu1 %v340_v35  ;;  %v356_v59 = vpack.c.bf16 %v178_v58, %v177_v57  ;;  %v162_v61 = vld [vmem:[%s581_s3 + $0x78] sm:$0xff]  ;;  %v36_v4 = vrot.slane %v31_v2, %v35_v1  ;;  %v40_v5 = vrot.slane %v31_v2, %v39_v3  ;;  %v281_v35 = vld [vmem:[%s582_s4] ss:$0 sm:$0xff] }
  0x12   :  { %v358_v62 = vpack.c.bf16 %v162_v61, %v161_v60 }
  0x14   :  { %343 = vmatpush3.bf16.msra.mxu1 %v342_v38 }
  0x15   :  { %345 = vmatprep.subr.bf16.mxu1 %v344_v41 }
  0x18   :  { %347 = vmatpush3.bf16.msra.mxu1 %v346_v44 }
  0x19   :  { %349 = vmatprep.subr.bf16.mxu1 %v348_v47 }
  0x1c   :  { %351 = vmatpush3.bf16.msra.mxu1 %v350_v50 }
  0x1d   :  { %353 = vmatprep.subr.bf16.mxu1 %v352_v53 }
  0x20   :  { %355 = vmatpush3.bf16.msra.mxu1 %v354_v56 }
  0x21   :  { %357 = vmatprep.subr.bf16.mxu1 %v356_v59 }
  0x24   :  { %359 = vmatpush3.bf16.msra.mxu1 %v358_v62 }
  0xdf   :  { %v116_v6 = vpop.f32.mrb[0].mxu0 }
  0xe0   :  { %v117_v7 = vadd.f32 %v116_v6, %v36_v4  ;;  %v118_v8 = vpop.f32.mrb[1].mxu0 }
  0xe1   :  { %v119_v9 = vadd.f32 %v118_v8, %v40_v5 }
  0xe2   :  { %v127_v10 = vmul.f32 0.70710677, %v117_v7 }
  0xe3   :  { %v128_v11 = vmul.f32 0.70710677, %v119_v9  ;;  %v122_v12 = vpop.f32.mrb[2].mxu0 }
  0xe4   :  { %364 = verf.f32 %v127_v10  ;;  %v123_v13 = vadd.f32 %v122_v12, %v36_v4  ;;  %v124_v14 = vpop.f32.mrb[3].mxu0 }
  0xe5   :  { %366 = verf.f32 %v128_v11  ;;  %v125_v15 = vadd.f32 %v124_v14, %v40_v5 }
  0xe6   :  { %v129_v16 = vmul.f32 0.70710677, %v123_v13 }
  0xe7   :  { %v130_v17 = vmul.f32 0.70710677, %v125_v15 }
  0xe8   :  { %368 = verf.f32 %v129_v16 }
  0xe9   :  { %370 = verf.f32 %v130_v17 }
  0xee   :  { %v365_v18 = vpop.eup %364 }
  0xef   :  { %v367_v19 = vpop.eup %366  ;;  %v135_v20 = vadd.f32 1.0, %v365_v18 }
  0xf0   :  { %v136_v21 = vadd.f32 1.0, %v367_v19 }
  0xf1   :  { %v139_v22 = vmul.f32 0.5, %v135_v20 }
  0xf2   :  { %v369_v23 = vpop.eup %368  ;;  %v140_v24 = vmul.f32 0.5, %v136_v21 }
  0xf3   :  { %v371_v25 = vpop.eup %370  ;;  %v137_v26 = vadd.f32 1.0, %v369_v23  ;;  %v143_v29 = vmul.f32 %v139_v22, %v117_v7 }
  0xf4   :  { %v138_v27 = vadd.f32 1.0, %v371_v25  ;;  %v144_v28 = vmul.f32 %v140_v24, %v119_v9 }
  0xf5   :  { %v141_v30 = vmul.f32 0.5, %v137_v26 }
  0xf6   :  { %v142_v31 = vmul.f32 0.5, %v138_v27  ;;  %250 = vmatprep.mubr.f32.mxu1 %v144_v28 }
  0xf7   :  { %251 = vmatmul.mubr.f32.vlgmr.msra.gmra.mrb[0].mxu1 %v143_v29  ;;  %v145_v33 = vmul.f32 %v141_v30, %v123_v13 }
  0xf8   :  { %v146_v32 = vmul.f32 %v142_v31, %v125_v15 }
  0xfa   :  { %255 = vmatprep.mubr.f32.mxu1 %v146_v32 }
  0xfb   :  { %256 = vmatmul.mubr.f32.gmra.mrb[2].mxu1 %v145_v33 }
 0x1ca   :  { %v314_v34 = vpop.f32.mrb[0].mxu1 }
 0x1cb   :  { %v315_v36 = vpop.f32.mrb[1].mxu1 }
 0x1cc   :  { %v316_v37 = vadd.f32 %v315_v36, %v314_v34 }
 0x1ce   :  { %v253_v38 = vadd.f32 %v316_v37, %v281_v35  ;;  %v317_v39 = vpop.f32.mrb[2].mxu1 }
 0x1cf   :  { %v318_v40 = vpop.f32.mrb[3].mxu1 }
 0x1d0   :  { %261 = vst.msk [vmem:[#allocation2] sm:$0xff] %vm43_vm0, %v253_v38  ;;  %v319_v41 = vadd.f32 %v318_v40, %v317_v39 }
 0x1d2   :  { %v258_v42 = vadd.f32 %v319_v41, %v281_v35 }
 0x1d4   :  { %262 = vst.msk [vmem:[#allocation2 + $0x8] sm:$0xff] %vm43_vm0, %v258_v42 }
 0x1d5   :  { %383 = shalt.err (!%p380_p4)
}
 0x1d6   :  { %s384_s28 = scalar_lea.hbm %s583_s5, 256 }
 0x1d7   :  { %p385_p5 = scmp.ne.s32.totalorder %s583_s5, %s384_s28  ;;  %p388_p6 = scmp.lt.u32.totalorder %s384_s28, %s583_s5 }
 0x1d9   :  { %p390_p7 = pnand %p388_p6, %p385_p5 }
 0x1db   :  { %393 = shalt.err (!%p390_p7)
}
 0x1dc   :  { %s398_s8 = smov 128   ;;  %s399_s9 = smov 8  }
 0x1dd   :  { %274 = dma.vmem_to_hbm [thread:$0]  %s269_s25, 256, %s583_s5, [#allocation3], %s398_s8, %s398_s8, %s399_s9  }
 0x1de   :  { %394 = dma.done.wait [#allocation3], 256  }
 0x1df   :  { %395 = vsyncadd [#allocation3], 4294967040 }
 0x1e0   :  { %278 = vsyncpa [#allocation3], 1 }

// kernel: tpu_custom_call.1
= control target key start
LH: loop header
LB: loop body
LE: loop exit
PB: predicated region body
PF: predicated region fallthrough
CT: control target
= control target key end

     0   :  { %v396_v7 = vmov 0.0   ;;  %s578_s0 = inlined_call_operand.vmem [shape: f32[16,32], index: 0, kind: input, shape index: {}]   ;;  %s579_s1 = inlined_call_operand.vmem [shape: f32[32,256], index: 1, kind: input, shape index: {}]   ;;  %s580_s2 = inlined_call_operand.vmem [shape: f32[1,256], index: 2, kind: input, shape index: {}]   ;;  %s581_s3 = inlined_call_operand.vmem [shape: f32[256,32], index: 3, kind: input, shape index: {}]   ;;  %s582_s4 = inlined_call_operand.vmem [shape: f32[1,32], index: 4, kind: input, shape index: {}]   ;;  %s583_s5 = inlined_call_operand.hbm [shape: f32[16,32], index: 5, kind: output, shape index: {}]  }
   0x1   :  { %v24_v0 = vld [vmem:[%s579_s1 + $0x8] sm:$0xff]  ;;  %v26_v1 = vld [vmem:[%s579_s1 + $0x18] sm:$0xff]  ;;  %v23_v2 = vld [vmem:[%s579_s1] sm:$0xff]  ;;  %114 = vmatprep.mubr.f32.mxu0 %v396_v7 }
   0x2   :  { %v320_v3 = vpack.c.bf16 %v26_v1, %v24_v0  ;;  %v25_v4 = vld [vmem:[%s579_s1 + $0x10] sm:$0xff]  ;;  %v28_v5 = vld [vmem:[%s579_s1 + $0x28] sm:$0xff]  ;;  %v30_v6 = vld [vmem:[%s579_s1 + $0x38] sm:$0xff] }
   0x3   :  { %v322_v8 = vpack.c.bf16 %v25_v4, %v23_v2  ;;  %v324_v9 = vpack.c.bf16 %v30_v6, %v28_v5  ;;  %v27_v10 = vld [vmem:[%s579_s1 + $0x20] sm:$0xff]  ;;  %v29_v11 = vld [vmem:[%s579_s1 + $0x30] sm:$0xff]  ;;  %v164_v13 = vld [vmem:[%s581_s3 + $0x88] sm:$0xff] }
   0x4   :  { %321 = vmatprep.subr.bf16.mxu0 %v320_v3  ;;  %v163_v12 = vld [vmem:[%s581_s3 + $0x80] sm:$0xff]  ;;  %v326_v14 = vpack.c.bf16 %v29_v11, %v27_v10  ;;  %v148_v17 = vld [vmem:[%s581_s3 + $0x8] sm:$0xff]  ;;  %v165_v18 = vld [vmem:[%s581_s3 + $0x90] sm:$0xff] }
   0x5   :  { %323 = vmatpush1.bf16.msra.mxu0 %v322_v8  ;;  %v328_v15 = vpack.c.bf16 %v164_v13, %v163_v12  ;;  %v147_v16 = vld [vmem:[%s581_s3] sm:$0xff]  ;;  %v166_v20 = vld [vmem:[%s581_s3 + $0x98] sm:$0xff]  ;;  %v149_v21 = vld [vmem:[%s581_s3 + $0x10] sm:$0xff] }
   0x6   :  { %325 = vmatprep.subr.bf16.mxu0 %v324_v9  ;;  %v330_v19 = vpack.c.bf16 %v148_v17, %v147_v16  ;;  %v150_v22 = vld [vmem:[%s581_s3 + $0x18] sm:$0xff]  ;;  %v332_v23 = vpack.c.bf16 %v166_v20, %v165_v18 }
   0x7   :  { %329 = vmatprep.subr.bf16.mxu1 %v328_v15 }
   0x8   :  { %10 = vsyncpa [#allocation3], 0  ;;  %331 = vmatpush3.bf16.msra.mxu1 %v330_v19  ;;  %v334_v24 = vpack.c.bf16 %v150_v22, %v149_v21  ;;  %v21_v25 = vld [vmem:[%s578_s0] sm:$0xff]  ;;  %vm43_vm0 = vcmask 261120   ;;  %v22_v26 = vld [vmem:[%s578_s0 + $0x8] sm:$0xff]  ;;  %v33_v63 = vlaneseq  ;;  %s397_s24 = smov [#allocation2]  }
   0x9   :  { %327 = vmatpush1.bf16.msra.mxu0 %v326_v14  ;;  %333 = vmatprep.subr.bf16.mxu1 %v332_v23  ;;  %v167_v27 = vld [vmem:[%s581_s3 + $0xa0] sm:$0xff]  ;;  %v168_v28 = vld [vmem:[%s581_s3 + $0xa8] sm:$0xff]  ;;  %v169_v33 = vld [vmem:[%s581_s3 + $0xb0] sm:$0xff]  ;;  %s268_s25 = sshll.u32 %s397_s24, 4  ;;  %s269_s25 = int_to_ptr.vmem [resolvable:$true] %s268_s25 }
   0xa   :  { %v336_v29 = vpack.c.bf16 %v168_v28, %v167_v27  ;;  %v151_v30 = vld [vmem:[%s581_s3 + $0x20] sm:$0xff]  ;;  %v152_v31 = vld [vmem:[%s581_s3 + $0x28] sm:$0xff]  ;;  %v170_v34 = vld [vmem:[%s581_s3 + $0xb8] sm:$0xff]  ;;  %v34_v0 = vshrl.u32 %v33_v63, 7  ;;  %s372_s26 = scalar_lea.vmem %s269_s25, 256  ;;  %p377_p1 = scmp.lt.s32.totalorder %s269_s25, %s269_s25 }
   0xb   :  { %v338_v32 = vpack.c.bf16 %v152_v31, %v151_v30  ;;  %v340_v35 = vpack.c.bf16 %v170_v34, %v169_v33  ;;  %v153_v36 = vld [vmem:[%s581_s3 + $0x30] sm:$0xff]  ;;  %v154_v37 = vld [vmem:[%s581_s3 + $0x38] sm:$0xff]  ;;  %v171_v39 = vld [vmem:[%s581_s3 + $0xc0] sm:$0xff]  ;;  %p373_p0 = scmp.ne.s32.totalorder %s269_s25, %s372_s26  ;;  %p378_p2 = scmp.lt.s32.totalorder %s372_s26, %s372_s26 }
   0xc   :  { %279 = vmatmul.mubr.msk.f32.vlgmr.msra.gmra.mrb[0].mxu0 %vm43_vm0, %v21_v25  ;;  %335 = vmatpush3.bf16.msra.mxu1 %v334_v24  ;;  %v342_v38 = vpack.c.bf16 %v154_v37, %v153_v36  ;;  %v172_v40 = vld [vmem:[%s581_s3 + $0xc8] sm:$0xff]  ;;  %v155_v42 = vld [vmem:[%s581_s3 + $0x40] sm:$0xff]  ;;  %v173_v45 = vld [vmem:[%s581_s3 + $0xd0] sm:$0xff]  ;;  %v35_v1 = vsub.s32 0, %v34_v0  ;;  %v39_v3 = vsub.s32 1, %v34_v0 }
   0xd   :  { %120 = vmatprep.mubr.f32.mxu0 %v396_v7  ;;  %337 = vmatprep.subr.bf16.mxu1 %v336_v29  ;;  %v344_v41 = vpack.c.bf16 %v172_v40, %v171_v39  ;;  %v156_v43 = vld [vmem:[%s581_s3 + $0x48] sm:$0xff]  ;;  %v174_v46 = vld [vmem:[%s581_s3 + $0xd8] sm:$0xff]  ;;  %v157_v48 = vld [vmem:[%s581_s3 + $0x50] sm:$0xff]  ;;  %p379_p3 = por %p378_p2, %p377_p1 }
   0xe   :  { %v346_v44 = vpack.c.bf16 %v156_v43, %v155_v42  ;;  %v348_v47 = vpack.c.bf16 %v174_v46, %v173_v45  ;;  %v158_v49 = vld [vmem:[%s581_s3 + $0x58] sm:$0xff]  ;;  %v175_v51 = vld [vmem:[%s581_s3 + $0xe0] sm:$0xff]  ;;  %v176_v52 = vld [vmem:[%s581_s3 + $0xe8] sm:$0xff] }
   0xf   :  { %v350_v50 = vpack.c.bf16 %v158_v49, %v157_v48  ;;  %v352_v53 = vpack.c.bf16 %v176_v52, %v175_v51  ;;  %v159_v54 = vld [vmem:[%s581_s3 + $0x60] sm:$0xff]  ;;  %v160_v55 = vld [vmem:[%s581_s3 + $0x68] sm:$0xff]  ;;  %v177_v57 = vld [vmem:[%s581_s3 + $0xf0] sm:$0xff]  ;;  %p380_p4 = pnand %p379_p3, %p373_p0 }
  0x10   :  { %280 = vmatmul.mubr.msk.f32.gmra.mrb[2].mxu0 %vm43_vm0, %v22_v26  ;;  %339 = vmatpush3.bf16.msra.mxu1 %v338_v32  ;;  %v354_v56 = vpack.c.bf16 %v160_v55, %v159_v54  ;;  %v178_v58 = vld [vmem:[%s581_s3 + $0xf8] sm:$0xff]  ;;  %v161_v60 = vld [vmem:[%s581_s3 + $0x70] sm:$0xff]  ;;  %v31_v2 = vld [vmem:[%s580_s2] sm:$0x3] }
  0x11   :  { %341 = vmatprep.subr.bf16.mxu1 %v340_v35  ;;  %v356_v59 = vpack.c.bf16 %v178_v58, %v177_v57  ;;  %v162_v61 = vld [vmem:[%s581_s3 + $0x78] sm:$0xff]  ;;  %v36_v4 = vrot.slane %v31_v2, %v35_v1  ;;  %v40_v5 = vrot.slane %v31_v2, %v39_v3  ;;  %v281_v35 = vld [vmem:[%s582_s4] ss:$0 sm:$0xff] }
  0x12   :  { %v358_v62 = vpack.c.bf16 %v162_v61, %v161_v60 }
  0x14   :  { %343 = vmatpush3.bf16.msra.mxu1 %v342_v38 }
  0x15   :  { %345 = vmatprep.subr.bf16.mxu1 %v344_v41 }
  0x18   :  { %347 = vmatpush3.bf16.msra.mxu1 %v346_v44 }
  0x19   :  { %349 = vmatprep.subr.bf16.mxu1 %v348_v47 }
  0x1c   :  { %351 = vmatpush3.bf16.msra.mxu1 %v350_v50 }
  0x1d   :  { %353 = vmatprep.subr.bf16.mxu1 %v352_v53 }
  0x20   :  { %355 = vmatpush3.bf16.msra.mxu1 %v354_v56 }
  0x21   :  { %357 = vmatprep.subr.bf16.mxu1 %v356_v59 }
  0x24   :  { %359 = vmatpush3.bf16.msra.mxu1 %v358_v62 }
  0xdf   :  { %v116_v6 = vpop.f32.mrb[0].mxu0 }
  0xe0   :  { %v117_v7 = vadd.f32 %v116_v6, %v36_v4  ;;  %v118_v8 = vpop.f32.mrb[1].mxu0 }
  0xe1   :  { %v119_v9 = vadd.f32 %v118_v8, %v40_v5 }
  0xe2   :  { %v127_v10 = vmul.f32 0.70710677, %v117_v7 }
  0xe3   :  { %v128_v11 = vmul.f32 0.70710677, %v119_v9  ;;  %v122_v12 = vpop.f32.mrb[2].mxu0 }
  0xe4   :  { %364 = verf.f32 %v127_v10  ;;  %v123_v13 = vadd.f32 %v122_v12, %v36_v4  ;;  %v124_v14 = vpop.f32.mrb[3].mxu0 }
  0xe5   :  { %366 = verf.f32 %v128_v11  ;;  %v125_v15 = vadd.f32 %v124_v14, %v40_v5 }
  0xe6   :  { %v129_v16 = vmul.f32 0.70710677, %v123_v13 }
  0xe7   :  { %v130_v17 = vmul.f32 0.70710677, %v125_v15 }
  0xe8   :  { %368 = verf.f32 %v129_v16 }
  0xe9   :  { %370 = verf.f32 %v130_v17 }
  0xee   :  { %v365_v18 = vpop.eup %364 }
  0xef   :  { %v367_v19 = vpop.eup %366  ;;  %v135_v20 = vadd.f32 1.0, %v365_v18 }
  0xf0   :  { %v136_v21 = vadd.f32 1.0, %v367_v19 }
  0xf1   :  { %v139_v22 = vmul.f32 0.5, %v135_v20 }
  0xf2   :  { %v369_v23 = vpop.eup %368  ;;  %v140_v24 = vmul.f32 0.5, %v136_v21 }
  0xf3   :  { %v371_v25 = vpop.eup %370  ;;  %v137_v26 = vadd.f32 1.0, %v369_v23  ;;  %v143_v29 = vmul.f32 %v139_v22, %v117_v7 }
  0xf4   :  { %v138_v27 = vadd.f32 1.0, %v371_v25  ;;  %v144_v28 = vmul.f32 %v140_v24, %v119_v9 }
  0xf5   :  { %v141_v30 = vmul.f32 0.5, %v137_v26 }
  0xf6   :  { %v142_v31 = vmul.f32 0.5, %v138_v27  ;;  %250 = vmatprep.mubr.f32.mxu1 %v144_v28 }
  0xf7   :  { %251 = vmatmul.mubr.f32.vlgmr.msra.gmra.mrb[0].mxu1 %v143_v29  ;;  %v145_v33 = vmul.f32 %v141_v30, %v123_v13 }
  0xf8   :  { %v146_v32 = vmul.f32 %v142_v31, %v125_v15 }
  0xfa   :  { %255 = vmatprep.mubr.f32.mxu1 %v146_v32 }
  0xfb   :  { %256 = vmatmul.mubr.f32.gmra.mrb[2].mxu1 %v145_v33 }
 0x1ca   :  { %v314_v34 = vpop.f32.mrb[0].mxu1 }
 0x1cb   :  { %v315_v36 = vpop.f32.mrb[1].mxu1 }
 0x1cc   :  { %v316_v37 = vadd.f32 %v315_v36, %v314_v34 }
 0x1ce   :  { %v253_v38 = vadd.f32 %v316_v37, %v281_v35  ;;  %v317_v39 = vpop.f32.mrb[2].mxu1 }
 0x1cf   :  { %v318_v40 = vpop.f32.mrb[3].mxu1 }
 0x1d0   :  { %261 = vst.msk [vmem:[#allocation2] sm:$0xff] %vm43_vm0, %v253_v38  ;;  %v319_v41 = vadd.f32 %v318_v40, %v317_v39 }
 0x1d2   :  { %v258_v42 = vadd.f32 %v319_v41, %v281_v35 }
 0x1d4   :  { %262 = vst.msk [vmem:[#allocation2 + $0x8] sm:$0xff] %vm43_vm0, %v258_v42 }
 0x1d5   :  { %383 = shalt.err (!%p380_p4)
}
 0x1d6   :  { %s384_s28 = scalar_lea.hbm %s583_s5, 256 }
 0x1d7   :  { %p385_p5 = scmp.ne.s32.totalorder %s583_s5, %s384_s28  ;;  %p388_p6 = scmp.lt.u32.totalorder %s384_s28, %s583_s5 }
 0x1d9   :  { %p390_p7 = pnand %p388_p6, %p385_p5 }
 0x1db   :  { %393 = shalt.err (!%p390_p7)
}
 0x1dc   :  { %s398_s8 = smov 128   ;;  %s399_s9 = smov 8  }
 0x1dd   :  { %274 = dma.vmem_to_hbm [thread:$0]  %s269_s25, 256, %s583_s5, [#allocation3], %s398_s8, %s398_s8, %s399_s9  }
 0x1de   :  { %394 = dma.done.wait [#allocation3], 256  }
 0x1df   :  { %395 = vsyncadd [#allocation3], 4294967040 }
 0x1e0   :  { %278 = vsyncpa [#allocation3], 1 }

</bundles_post_ra>
